<compile_context>
chip_gen: v7x
topology: tpu7x:2x2x1
jax: 0.10.0
libtpu: 0.0.40
codegen_flags: <defaults>
</compile_context>

<pallas_src>
import functools

import jax
import jax.numpy as jnp
from jax.experimental import pallas as pl
from jax.experimental.pallas import tpu as pltpu

LANE = 128
SUBLANE = 8


def _focal_kernel(x_ref, t_ref, out_ref, acc_ref, *, alpha, gamma, int_gamma):
    i = pl.program_id(1)

    @pl.when(i == 0)
    def _():
        acc_ref[...] = jnp.zeros_like(acc_ref)

    x = x_ref[...].astype(jnp.float32)
    t = t_ref[...].astype(jnp.float32)

    # Numerically stable BCE with logits (matches torch BCEWithLogits, reduction='none'):
    #   bce = max(x, 0) - x*t + log(1 + exp(-|x|))
    bce = jnp.maximum(x, 0.0) - x * t + jnp.log1p(jnp.exp(-jnp.abs(x)))
    pt = jnp.exp(-bce)
    omp = 1.0 - pt

    if int_gamma is not None:
        if int_gamma == 0:
            mod = jnp.ones_like(omp)
        else:
            mod = omp
            for _ in range(int_gamma - 1):
                mod = mod * omp
    else:
        # Non-integer gamma: fall back to pow (exp/log on the EUP).
        mod = omp ** jnp.float32(gamma)

    focal = (jnp.float32(alpha) * bce) * mod

    # Vector-shaped accumulation: fold the tile's rows down to one (8, 128) vreg
    # with VPU adds; defer the full cross-lane reduce to the epilogue.
    tm = focal.shape[0]
    acc_ref[...] += jnp.sum(focal.reshape(tm // SUBLANE, SUBLANE, LANE), axis=0)

    @pl.when(i == pl.num_programs(1) - 1)
    def _():
        out_ref[0, 0] = jnp.sum(acc_ref[...])


def focal_loss_pallas(inputs, targets, alpha=0.25, gamma=2.0, *,
                      tile_rows=1024, num_splits=None):
    assert inputs.shape == targets.shape
    n_total = 1
    for d in inputs.shape:
        n_total *= d

    rows_needed = pl.cdiv(n_total, LANE)

    # Tile rows: multiple of the 8-row sublane granule, capped at tile_rows.
    tm = min(int(tile_rows), rows_needed)
    tm = max(SUBLANE, ((tm + SUBLANE - 1) // SUBLANE) * SUBLANE)

    # Split the row range across 2 partial sums (one per TensorCore on v7x) only
    # when each split gets at least a full tile of work.
    if num_splits is None:
        num_splits = 2 if rows_needed >= 2 * tm else 1

    chunk = num_splits * tm
    rows_padded = ((rows_needed + chunk - 1) // chunk) * chunk
    inner_steps = rows_padded // chunk

    # Pad with (x=40, t=1): bce = log1p(exp(-40)) ~ 4e-18, pt rounds to 1.0 in f32,
    # so (1 - pt) == 0 exactly and the padded elements contribute exactly 0.
    pad_elems = rows_padded * LANE - n_total
    x_flat = inputs.reshape(-1)
    t_flat = targets.reshape(-1)
    if pad_elems:
        x_flat = jnp.concatenate(
            [x_flat, jnp.full((pad_elems,), 40.0, dtype=inputs.dtype)])
        t_flat = jnp.concatenate(
            [t_flat, jnp.full((pad_elems,), 1.0, dtype=targets.dtype)])

    x2d = x_flat.reshape(rows_padded, LANE)
    t2d = t_flat.reshape(rows_padded, LANE)

    g = float(gamma)
    int_gamma = int(g) if (g.is_integer() and 0.0 <= g <= 8.0) else None

    kernel = functools.partial(
        _focal_kernel, alpha=float(alpha), gamma=g, int_gamma=int_gamma)

    in_map = lambda c, i: (c * inner_steps + i, 0)

    partials = pl.pallas_call(
        kernel,
        out_shape=jax.ShapeDtypeStruct((num_splits, 1), jnp.float32),
        grid_spec=pltpu.PrefetchScalarGridSpec(
            num_scalar_prefetch=0,
            grid=(num_splits, inner_steps),
            in_specs=[
                pl.BlockSpec((tm, LANE), in_map),
                pl.BlockSpec((tm, LANE), in_map),
            ],
            out_specs=pl.BlockSpec(
                (1, 1), lambda c, i: (c, 0), memory_space=pltpu.SMEM),
            scratch_shapes=[pltpu.VMEM((SUBLANE, LANE), jnp.float32)],
        ),
        compiler_params=pltpu.CompilerParams(
            dimension_semantics=("parallel", "arbitrary")),
    )(x2d, t2d)

    return jnp.sum(partials) / jnp.float32(n_total)


def focal_loss_ref(inputs, targets, alpha=0.25, gamma=2.0):
    x = inputs.astype(jnp.float32)
    t = targets.astype(jnp.float32)
    bce = jnp.maximum(x, 0.0) - x * t + jnp.log1p(jnp.exp(-jnp.abs(x)))
    pt = jnp.exp(-bce)
    return jnp.mean(alpha * (1.0 - pt) ** gamma * bce)


if __name__ == "__main__":
    key = jax.random.PRNGKey(0)
    alpha, gamma = 0.25, 2.0

    # Primary case: module-consistent NCHW logits + binary targets.
    k1, k2, k3, k4, k5, k6 = jax.random.split(key, 6)
    inputs = jax.random.normal(k1, (2, 4, 16, 16), dtype=jnp.float32)
    targets = jax.random.bernoulli(k2, 0.5, (2, 4, 16, 16)).astype(jnp.float32)
    loss = jax.block_until_ready(focal_loss_pallas(inputs, targets, alpha, gamma))
    ref = focal_loss_ref(inputs, targets, alpha, gamma)
    assert jnp.allclose(loss, ref, rtol=1e-5, atol=1e-6), (loss, ref)

    # Larger case: exercises the 2-way parallel split path.
    x_big = jax.random.normal(k3, (4, 8, 64, 128), dtype=jnp.float32)
    t_big = jax.random.bernoulli(k4, 0.5, (4, 8, 64, 128)).astype(jnp.float32)
    loss_big = jax.block_until_ready(focal_loss_pallas(x_big, t_big, alpha, gamma))
    ref_big = focal_loss_ref(x_big, t_big, alpha, gamma)
    assert jnp.allclose(loss_big, ref_big, rtol=1e-5, atol=1e-6), (loss_big, ref_big)

    # Ragged case: exercises zero-contribution padding.
    x_odd = jax.random.normal(k5, (3, 5, 7, 11), dtype=jnp.float32)
    t_odd = jax.random.bernoulli(k6, 0.5, (3, 5, 7, 11)).astype(jnp.float32)
    loss_odd = jax.block_until_ready(focal_loss_pallas(x_odd, t_odd, alpha, gamma))
    ref_odd = focal_loss_ref(x_odd, t_odd, alpha, gamma)
    assert jnp.allclose(loss_odd, ref_odd, rtol=1e-5, atol=1e-6), (loss_odd, ref_odd)

    print("KERNEL_OK")
</pallas_src>

<mosaic_0001>
module attributes {stable_mosaic.version = 11 : i64} {
  func.func @_focal_kernel(%arg0: i32, %arg1: i32, %arg2: memref<16x128xf32, #tpu.memory_space<vmem>>, %arg3: memref<16x128xf32, #tpu.memory_space<vmem>>, %arg4: memref<1x1xf32, #tpu.memory_space<smem>>, %arg5: memref<8x128xf32, #tpu.memory_space<vmem>>) attributes {dimension_semantics = [#tpu.dimension_semantics<parallel>, #tpu.dimension_semantics<arbitrary>], iteration_bounds = array<i64: 1, 1>, scalar_prefetch = 0 : i64, scratch_operands = 1 : i64, tpu.core_type = #tpu.core_type<tc>, window_params = [{transform_indices = @transform_0, window_bounds = array<i64: 16, 128>}, {transform_indices = @transform_1, window_bounds = array<i64: 16, 128>}, {transform_indices = @transform_2, window_bounds = array<i64: 1, 1>}]} {
    %c0_i32 = arith.constant 0 : i32
    %0 = arith.cmpi eq, %arg1, %c0_i32 : i32
    %1 = arith.extui %0 : i1 to i32
    %c0_i32_0 = arith.constant 0 : i32
    %2 = arith.cmpi ne, %1, %c0_i32_0 : i32
    scf.if %2 {
      %cst_15 = arith.constant 0.000000e+00 : f32
      %32 = vector.broadcast %cst_15 : f32 to vector<8x128xf32>
      %c0_16 = arith.constant 0 : index
      %c0_17 = arith.constant 0 : index
      %33 = vector.load %arg5[%c0_16, %c0_17] : memref<8x128xf32, #tpu.memory_space<vmem>>, vector<8x128xf32>
      tpu.vector_store %arg5[%c0_16, %c0_17], %32 {strides = array<i32>} : memref<8x128xf32, #tpu.memory_space<vmem>>, vector<8x128xf32>,
    } else {
    }
    %c0 = arith.constant 0 : index
    %c0_1 = arith.constant 0 : index
    %3 = vector.load %arg2[%c0, %c0_1] : memref<16x128xf32, #tpu.memory_space<vmem>>, vector<16x128xf32>
    %c0_2 = arith.constant 0 : index
    %c0_3 = arith.constant 0 : index
    %4 = vector.load %arg3[%c0_2, %c0_3] : memref<16x128xf32, #tpu.memory_space<vmem>>, vector<16x128xf32>
    %cst = arith.constant 0.000000e+00 : f32
    %5 = vector.broadcast %cst : f32 to vector<16x128xf32>
    %6 = arith.maximumf %3, %5 : vector<16x128xf32>
    %7 = arith.mulf %3, %4 : vector<16x128xf32>
    %8 = arith.subf %6, %7 : vector<16x128xf32>
    %9 = math.absf %3 : vector<16x128xf32>
    %cst_4 = arith.constant 0.000000e+00 : f32
    %10 = vector.broadcast %cst_4 : f32 to vector<16x128xf32>
    %11 = arith.subf %10, %9 : vector<16x128xf32>
    %12 = math.exp %11 : vector<16x128xf32>
    %13 = math.log1p %12 : vector<16x128xf32>
    %14 = arith.addf %8, %13 : vector<16x128xf32>
    %cst_5 = arith.constant 0.000000e+00 : f32
    %15 = vector.broadcast %cst_5 : f32 to vector<16x128xf32>
    %16 = arith.subf %15, %14 : vector<16x128xf32>
    %17 = math.exp %16 : vector<16x128xf32>
    %cst_6 = arith.constant 1.000000e+00 : f32
    %18 = vector.broadcast %cst_6 : f32 to vector<16x128xf32>
    %19 = arith.subf %18, %17 : vector<16x128xf32>
    %20 = arith.mulf %19, %19 : vector<16x128xf32>
    %cst_7 = arith.constant 2.500000e-01 : f32
    %21 = vector.broadcast %cst_7 : f32 to vector<16x128xf32>
    %22 = arith.mulf %21, %14 : vector<16x128xf32>
    %23 = arith.mulf %22, %20 : vector<16x128xf32>
    %c0_8 = arith.constant 0 : index
    %c0_9 = arith.constant 0 : index
    %24 = vector.load %arg5[%c0_8, %c0_9] : memref<8x128xf32, #tpu.memory_space<vmem>>, vector<8x128xf32>
    %25 = vector.shape_cast %23 : vector<16x128xf32> to vector<2x8x128xf32>
    %cst_10 = arith.constant dense<0.000000e+00> : vector<8x128xf32>
    %26 = vector.multi_reduction <add>, %25, %cst_10 [0] : vector<2x8x128xf32> to vector<8x128xf32>
    %27 = arith.addf %24, %26 : vector<8x128xf32>
    %c0_11 = arith.constant 0 : index
    %c0_12 = arith.constant 0 : index
    %28 = vector.load %arg5[%c0_11, %c0_12] : memref<8x128xf32, #tpu.memory_space<vmem>>, vector<8x128xf32>
    tpu.vector_store %arg5[%c0_11, %c0_12], %27 {strides = array<i32>} : memref<8x128xf32, #tpu.memory_space<vmem>>, vector<8x128xf32>,
    %c0_i32_13 = arith.constant 0 : i32
    %29 = arith.cmpi eq, %arg1, %c0_i32_13 : i32
    %30 = arith.extui %29 : i1 to i32
    %c0_i32_14 = arith.constant 0 : i32
    %31 = arith.cmpi ne, %30, %c0_i32_14 : i32
    scf.if %31 {
      %c0_15 = arith.constant 0 : index
      %c0_16 = arith.constant 0 : index
      %32 = vector.load %arg5[%c0_15, %c0_16] : memref<8x128xf32, #tpu.memory_space<vmem>>, vector<8x128xf32>
      %33 = vector.shape_cast %32 : vector<8x128xf32> to vector<1x8x128xf32>
      %cst_17 = arith.constant dense<0.000000e+00> : vector<1xf32>
      %34 = vector.multi_reduction <add>, %33, %cst_17 [1, 2] : vector<1x8x128xf32> to vector<1xf32>
      %35 = vector.shape_cast %34 : vector<1xf32> to vector<1x1x1xf32>
      %36 = vector.extract %35[0, 0, 0] : f32 from vector<1x1x1xf32>
      %c0_18 = arith.constant 0 : index
      %c0_19 = arith.constant 0 : index
      %37 = memref.load %arg4[%c0_18, %c0_19] : memref<1x1xf32, #tpu.memory_space<smem>>
      memref.store %36, %arg4[%c0_18, %c0_19] : memref<1x1xf32, #tpu.memory_space<smem>>
    } else {
    }
    return
  }
  func.func @transform_0(%arg0: i32, %arg1: i32) -> (i32, i32) {
    %c1_i32 = arith.constant 1 : i32
    %0 = arith.muli %arg0, %c1_i32 : i32
    %1 = arith.addi %0, %arg1 : i32
    %c0_i32 = arith.constant 0 : i32
    %c0_i32_0 = arith.constant 0 : i32
    return %1, %c0_i32 : i32, i32
  }
  func.func @transform_1(%arg0: i32, %arg1: i32) -> (i32, i32) {
    %c1_i32 = arith.constant 1 : i32
    %0 = arith.muli %arg0, %c1_i32 : i32
    %1 = arith.addi %0, %arg1 : i32
    %c0_i32 = arith.constant 0 : i32
    %c0_i32_0 = arith.constant 0 : i32
    return %1, %c0_i32 : i32, i32
  }
  func.func @transform_2(%arg0: i32, %arg1: i32) -> (i32, i32) {
    %c0_i32 = arith.constant 0 : i32
    %c0_i32_0 = arith.constant 0 : i32
    return %arg0, %c0_i32 : i32, i32
  }
}

</mosaic_0001>

<bundles_post_ra>
// kernel: tpu_custom_call.1
= control target key start
LH: loop header
LB: loop body
LE: loop exit
PB: predicated region body
PF: predicated region fallthrough
CT: control target
= control target key end

     0   :  { %7 = vsyncpa [#allocation4], 0  ;;  %s278_s0 = inlined_call_operand.hbm [shape: f32[16,128], index: 0, kind: input, shape index: {}]   ;;  %s279_s1 = inlined_call_operand.hbm [shape: f32[16,128], index: 1, kind: input, shape index: {}]   ;;  %s280_s2 = inlined_call_operand.hbm [shape: f32[1,1], index: 2, kind: output, shape index: {}]  }
   0x1   :  { %8 = vsyncpa [#allocation7], 0 }
   0x2   :  { %9 = vsyncpa [#allocation5], 0  ;;  %s222_s9 = smov [#allocation3]   ;;  %s162_s13 = scalar_lea.hbm %s278_s0, 256 }
   0x3   :  { %s19_s10 = sshll.u32 %s222_s9, 4  ;;  %p163_p0 = scmp.ne.s32.totalorder %s278_s0, %s162_s13  ;;  %s20_s10 = int_to_ptr.vmem [resolvable:$true] %s19_s10 }
   0x4   :  { %p166_p1 = scmp.lt.u32.totalorder %s162_s13, %s278_s0 }
   0x6   :  { %p168_p2 = pnand %p166_p1, %p163_p0 }
   0x8   :  { %171 = shalt.err (!%p168_p2)
}
   0x9   :  { %s172_s18 = scalar_lea.vmem %s20_s10, 256  ;;  %p177_p4 = scmp.lt.s32.totalorder %s20_s10, %s20_s10 }
   0xa   :  { %p173_p3 = scmp.ne.s32.totalorder %s20_s10, %s172_s18  ;;  %p178_p5 = scmp.lt.s32.totalorder %s172_s18, %s172_s18 }
   0xc   :  { %p179_p6 = por %p178_p5, %p177_p4 }
   0xe   :  { %p180_p7 = pnand %p179_p6, %p173_p3 }
  0x10   :  { %183 = shalt.err (!%p180_p7)
}
  0x11   :  { %s223_s19 = smov 128   ;;  %s224_s20 = smov 8  }
  0x12   :  { %25 = dma.hbm_to_vmem [thread:$0]  %s278_s0, 256, %s20_s10, [#allocation4], %s223_s19, %s223_s19, %s224_s20  }
  0x13   :  { %s225_s23 = smov [#allocation6]   ;;  %s184_s27 = scalar_lea.hbm %s279_s1, 256 }
  0x14   :  { %s35_s24 = sshll.u32 %s225_s23, 4  ;;  %p185_p8 = scmp.ne.s32.totalorder %s279_s1, %s184_s27  ;;  %s36_s24 = int_to_ptr.vmem [resolvable:$true] %s35_s24 }
  0x15   :  { %p188_p9 = scmp.lt.u32.totalorder %s184_s27, %s279_s1 }
  0x17   :  { %p190_p10 = pnand %p188_p9, %p185_p8 }
  0x19   :  { %193 = shalt.err (!%p190_p10)
}
  0x1a   :  { %s194_s4 = scalar_lea.vmem %s36_s24, 256  ;;  %p199_p12 = scmp.lt.s32.totalorder %s36_s24, %s36_s24 }
  0x1b   :  { %p195_p11 = scmp.ne.s32.totalorder %s36_s24, %s194_s4  ;;  %p200_p13 = scmp.lt.s32.totalorder %s194_s4, %s194_s4 }
  0x1d   :  { %p201_p0 = por %p200_p13, %p199_p12 }
  0x1f   :  { %p202_p1 = pnand %p201_p0, %p195_p11 }
  0x21   :  { %205 = shalt.err (!%p202_p1)
}
  0x22   :  { %41 = dma.hbm_to_vmem [thread:$0]  %s279_s1, 256, %s36_s24, [#allocation7], %s223_s19, %s223_s19, %s224_s20  }
  0x23   :  { %216 = dma.done.wait [#allocation4], 256  }
  0x24   :  { %217 = vsyncadd [#allocation4], 4294967040 }
  0x25   :  { %218 = dma.done.wait [#allocation7], 256  }
  0x26   :  { %219 = vsyncadd [#allocation7], 4294967040  ;;  %v57_v0 = vld [vmem:[#allocation3] sm:$0xff]  ;;  %v58_v1 = vld [vmem:[#allocation3 + $0x8] sm:$0xff]  ;;  %s206_s8 = scalar_lea.hbm %s280_s2, 16 }
  0x27   :  { %v67_v2 = vand.u32 2147483647, %v57_v0  ;;  %v68_v3 = vand.u32 2147483647, %v58_v1  ;;  %v59_v14 = vld [vmem:[#allocation6] sm:$0xff]  ;;  %v60_v15 = vld [vmem:[#allocation6 + $0x8] sm:$0xff]  ;;  %p207_p2 = scmp.ne.s32.totalorder %s280_s2, %s206_s8  ;;  %p210_p3 = scmp.lt.u32.totalorder %s206_s8, %s280_s2 }
  0x28   :  { %v61_v17 = vmax.f32 %v57_v0, 0.0  ;;  %v63_v18 = vmul.f32 %v59_v14, %v57_v0  ;;  %v62_v21 = vmax.f32 %v58_v1, 0.0  ;;  %v64_v22 = vmul.f32 %v60_v15, %v58_v1 }
  0x29   :  { %v69_v4 = vsub.f32 0.0, %v67_v2  ;;  %v70_v5 = vsub.f32 0.0, %v68_v3  ;;  %p212_p4 = pnand %p210_p3, %p207_p2 }
  0x2a   :  { %v65_v26 = vsub.f32 %v61_v17, %v63_v18  ;;  %v66_v29 = vsub.f32 %v62_v21, %v64_v22 }
  0x2b   :  { %v71_v6 = vmul.f32 1.442695, %v69_v4  ;;  %v73_v7 = vmul.f32 1.442695, %v70_v5 }
  0x2d   :  { %150 = vpow2.f32 %v71_v6 }
  0x2e   :  { %152 = vpow2.f32 %v73_v7 }
  0x37   :  { %v151_v8 = vpop.eup %150 }
  0x38   :  { %v153_v9 = vpop.eup %152  ;;  %v75_v10 = vadd.f32 1.0, %v151_v8  ;;  %v78_v12 = vmul.f32 -0.5, %v151_v8  ;;  %v81_v19 = vand.u32 2147483647, %v151_v8 }
  0x39   :  { %v84_v11 = vadd.f32 1.0, %v153_v9  ;;  %v87_v13 = vmul.f32 -0.5, %v153_v9  ;;  %v90_v23 = vand.u32 2147483647, %v153_v9 }
  0x3a   :  { %154 = vlog2.f32 %v75_v10  ;;  %v79_v16 = vadd.f32 1.0, %v78_v12  ;;  %vm82_vm0 = vcmp.lt.f32.partialorder %v81_v19, 0.0004427343 }
  0x3b   :  { %156 = vlog2.f32 %v84_v11  ;;  %v88_v20 = vadd.f32 1.0, %v87_v13  ;;  %vm91_vm1 = vcmp.lt.f32.partialorder %v90_v23, 0.0004427343 }
  0x3c   :  { %v80_v24 = vmul.f32 %v151_v8, %v79_v16 }
  0x3d   :  { %v89_v27 = vmul.f32 %v153_v9, %v88_v20 }
  0x44   :  { %v155_v25 = vpop.eup %154 }
  0x45   :  { %v157_v28 = vpop.eup %156  ;;  %v77_v30 = vmul.f32 0.6931472, %v155_v25 }
  0x46   :  { %v86_v31 = vmul.f32 0.6931472, %v157_v28 }
  0x47   :  { %v83_v32 = vsel %vm82_vm0, %v80_v24, %v77_v30 }
  0x48   :  { %v92_v33 = vsel %vm91_vm1, %v89_v27, %v86_v31  ;;  %v93_v34 = vadd.f32 %v83_v32, %v65_v26 }
  0x49   :  { %v94_v35 = vadd.f32 %v92_v33, %v66_v29 }
  0x4a   :  { %v95_v36 = vsub.f32 0.0, %v93_v34  ;;  %v105_v43 = vmul.f32 0.25, %v93_v34 }
  0x4b   :  { %v96_v37 = vsub.f32 0.0, %v94_v35  ;;  %v106_v45 = vmul.f32 0.25, %v94_v35 }
  0x4c   :  { %v97_v38 = vmul.f32 1.442695, %v95_v36 }
  0x4d   :  { %v99_v39 = vmul.f32 1.442695, %v96_v37 }
  0x4e   :  { %158 = vpow2.f32 %v97_v38 }
  0x4f   :  { %160 = vpow2.f32 %v99_v39 }
  0x58   :  { %v159_v40 = vpop.eup %158 }
  0x59   :  { %v161_v41 = vpop.eup %160  ;;  %v101_v42 = vsub.f32 1.0, %v159_v40 }
  0x5a   :  { %v102_v44 = vsub.f32 1.0, %v161_v41 }
  0x5b   :  { %v103_v46 = vmul.f32 %v101_v42, %v101_v42 }
  0x5c   :  { %v104_v47 = vmul.f32 %v102_v44, %v102_v44 }
  0x5d   :  { %v107_v48 = vmul.f32 %v105_v43, %v103_v46 }
  0x5e   :  { %v108_v49 = vmul.f32 %v106_v45, %v104_v47 }
  0x60   :  { %v110_v50 = vadd.f32 %v108_v49, %v107_v48 }
  0x62   :  { %117 = vadd.xlane.f32.xlu0 %v110_v50 }
  0xef   :  { %v118_v51 = vpop.xlane.xlu0 %117 }
  0xf0   :  { %v119_v52 = vrot.slane %v118_v51, 4 }
  0xf2   :  { %v120_v53 = vadd.f32 %v119_v52, %v118_v51 }
  0xf4   :  { %v121_v54 = vrot.slane %v120_v53, 2 }
  0xf6   :  { %v122_v55 = vadd.f32 %v121_v54, %v120_v53 }
  0xf8   :  { %v123_v56 = vrot.slane %v122_v55, 1 }
  0xfa   :  { %v124_v57 = vadd.f32 %v123_v56, %v122_v55 }
  0xfc   :  { %143 = vpush %v124_v57 }
 0x12d   :  { %s144_s1 = spop %143 }
 0x12e   :  { %127 = sst [smem:[#allocation8]] %s144_s1 }
 0x12f   :  { %215 = shalt.err (!%p212_p4)
}
 0x130   :  { %s226_s13 = smov [#allocation8]  }
 0x131   :  { %135 = dma.smem_to_hbm %s226_s13, 16, %s280_s2, [#allocation5]  }
 0x132   :  { %220 = dma.done.wait [#allocation5], 16  }
 0x133   :  { %221 = vsyncadd [#allocation5], 4294967280 }
 0x134   :  { %139 = sfence }
 0x135   :  { %140 = vsyncpa [#allocation4], 1 }
 0x136   :  { %141 = vsyncpa [#allocation7], 1 }
 0x137   :  { %142 = vsyncpa [#allocation5], 1 }

</bundles_post_ra>
